<compile_context>
chip_gen: v5e
topology: v5e:2x2
jax: 0.10.0
libtpu: 0.0.40
codegen_flags: <defaults>
</compile_context>

<pallas_src>
import functools

import jax
import jax.numpy as jnp
from jax.experimental import pallas as pl
from jax.experimental.pallas import tpu as pltpu


_LANE = 128
_SUBLANE = 8
_VMEM_LIMIT = 32 * 1024 * 1024          # safe on v5e/v6e (128 MiB) and v7x (64 MiB)
_FUSED_WEIGHT_BUDGET = 4 * 1024 * 1024  # fused path keeps both weights VMEM-resident


def _round_up(x, m):
    return (x + m - 1) // m * m


def _divisor_tile(dim_p, unit, cap):
    """Largest multiple of `unit` that divides dim_p and is <= cap."""
    best = unit
    t = unit
    limit = min(dim_p, cap)
    while t <= limit:
        if dim_p % t == 0:
            best = t
        t += unit
    return best


def _vmem_capacity_bytes():
    try:
        return pltpu.get_tpu_info().vmem_capacity_bytes
    except Exception:
        return 64 * 1024 * 1024  # conservative (v7x-sized) default


def _gemm_tiles(Mp, Kp, Np):
    # Per-generation tile table: v7x has 64 MiB VMEM/TC, v5e/v6e have 128 MiB.
    if _vmem_capacity_bytes() > 64 * 1024 * 1024:
        cap_m, cap_n, cap_k = 512, 512, 1024    # v5e / v6e
    else:
        cap_m, cap_n, cap_k = 256, 256, 1024    # v7x
    tm = _divisor_tile(Mp, _SUBLANE, cap_m)
    tn = _divisor_tile(Np, _LANE, cap_n)
    tk = _divisor_tile(Kp, _LANE, cap_k)
    return tm, tn, tk


# ---------------------------------------------------------------------------
# One-time parameter preparation (hoisted out of the per-forward path):
# transpose weights to MXU-friendly [K, N], zero-pad K/H/N up to multiples of
# 128 (lane-dense tiles, no masked stores), reshape biases to (1, Np) rows.
# Zero padding keeps the math exact (zero weight cols + zero bias + ReLU(0)=0).
# ---------------------------------------------------------------------------
def prepare_params(w1, b1, w2, b2, compute_dtype=jnp.float32):
    H, K = w1.shape
    N, H2 = w2.shape
    assert H == H2
    Kp, Hp, Np = _round_up(K, _LANE), _round_up(H, _LANE), _round_up(N, _LANE)
    w1t = jnp.pad(w1.T, ((0, Kp - K), (0, Hp - H))).astype(compute_dtype)
    w2t = jnp.pad(w2.T, ((0, Hp - H), (0, Np - N))).astype(compute_dtype)
    b1p = jnp.pad(b1.astype(jnp.float32), (0, Hp - H)).reshape(1, Hp)
    b2p = jnp.pad(b2.astype(jnp.float32), (0, Np - N)).reshape(1, Np)
    return dict(w1t=w1t, b1=b1p, w2t=w2t, b2=b2p,
                K=K, H=H, N=N, compute_dtype=compute_dtype)


# ---------------------------------------------------------------------------
# Fused path: both linears in one kernel body; hidden tile stays in VMEM.
# ---------------------------------------------------------------------------
def fused_mlp_kernel(x_ref, w1t_ref, b1_ref, w2t_ref, b2_ref, o_ref, *,
                     compute_dtype):
    prec = jax.lax.Precision.HIGHEST if compute_dtype == jnp.float32 else None
    x = x_ref[...].astype(compute_dtype)
    # linear1 + bias + ReLU: the (tm, Hp) hidden tile never leaves VMEM/vregs.
    h = jnp.dot(x, w1t_ref[...], preferred_element_type=jnp.float32,
                precision=prec)
    h = jnp.maximum(h + b1_ref[...], 0.0)
    # linear2 + bias, single cast on the way out.
    y = jnp.dot(h.astype(compute_dtype), w2t_ref[...],
                preferred_element_type=jnp.float32, precision=prec)
    o_ref[...] = (y + b2_ref[...]).astype(o_ref.dtype)


def _fused_forward(xp, params, out_dtype):
    Mp = xp.shape[0]
    w1t, b1, w2t, b2 = params["w1t"], params["b1"], params["w2t"], params["b2"]
    Kp, Hp = w1t.shape
    Np = w2t.shape[1]
    cdt = params["compute_dtype"]

    # Prefer >= 2 row tiles so the "parallel" M axis can shard across v7x's
    # two TensorCores (and the pipeline overlaps) even for small problems.
    cands = [t for t in range(_SUBLANE, min(Mp, 512) + 1, _SUBLANE)
             if Mp % t == 0]
    multi = [t for t in cands if Mp // t >= 2]
    tm = max(multi) if multi else (max(cands) if cands else Mp)

    return pl.pallas_call(
        functools.partial(fused_mlp_kernel, compute_dtype=cdt),
        out_shape=jax.ShapeDtypeStruct((Mp, Np), out_dtype),
        grid_spec=pltpu.PrefetchScalarGridSpec(
            num_scalar_prefetch=0,
            grid=(Mp // tm,),
            in_specs=[
                pl.BlockSpec((tm, Kp), lambda i: (i, 0)),
                # Weight / bias block indices are i-invariant -> they stay
                # resident in VMEM (no re-DMA across M tiles).
                pl.BlockSpec((Kp, Hp), lambda i: (0, 0)),
                pl.BlockSpec((1, Hp), lambda i: (0, 0)),
                pl.BlockSpec((Hp, Np), lambda i: (0, 0)),
                pl.BlockSpec((1, Np), lambda i: (0, 0)),
            ],
            out_specs=pl.BlockSpec((tm, Np), lambda i: (i, 0)),
        ),
        compiler_params=pltpu.CompilerParams(
            dimension_semantics=("parallel",),
            vmem_limit_bytes=_VMEM_LIMIT,
        ),
    )(xp, w1t, b1, w2t, b2)


# ---------------------------------------------------------------------------
# Fallback path for weights too large to keep VMEM-resident: tiled GEMM with
# K innermost, accumulating directly into the f32 output block (no scratch),
# bias folded into the k==0 init, optional fused ReLU in the epilogue.
# ---------------------------------------------------------------------------
def linear_kernel(x_ref, wt_ref, b_ref, o_ref, *, apply_relu, compute_dtype):
    k = pl.program_id(2)
    prec = jax.lax.Precision.HIGHEST if compute_dtype == jnp.float32 else None

    @pl.when(k == 0)
    def _():
        # Fold the (1, tn) bias broadcast into the init write.
        o_ref[...] = jnp.broadcast_to(b_ref[...], o_ref.shape)

    # o_ref is VMEM-resident across k (its index_map ignores k), so accumulate
    # straight into it.
    o_ref[...] += jnp.dot(x_ref[...].astype(compute_dtype), wt_ref[...],
                          preferred_element_type=jnp.float32, precision=prec)

    if apply_relu:
        @pl.when(k == pl.num_programs(2) - 1)
        def _():
            o_ref[...] = jnp.maximum(o_ref[...], 0.0)


def _linear_padded(xp, wtp, bp, *, apply_relu, compute_dtype):
    Mp, Kp = xp.shape
    Kp2, Np = wtp.shape
    assert Kp == Kp2
    tm, tn, tk = _gemm_tiles(Mp, Kp, Np)
    return pl.pallas_call(
        functools.partial(linear_kernel, apply_relu=apply_relu,
                          compute_dtype=compute_dtype),
        out_shape=jax.ShapeDtypeStruct((Mp, Np), jnp.float32),
        grid_spec=pltpu.PrefetchScalarGridSpec(
            num_scalar_prefetch=0,
            grid=(Mp // tm, Np // tn, Kp // tk),
            in_specs=[
                pl.BlockSpec((tm, tk), lambda i, j, k: (i, k)),
                pl.BlockSpec((tk, tn), lambda i, j, k: (k, j)),
                pl.BlockSpec((1, tn), lambda i, j, k: (0, j)),
            ],
            out_specs=pl.BlockSpec((tm, tn), lambda i, j, k: (i, j)),
        ),
        compiler_params=pltpu.CompilerParams(
            dimension_semantics=("parallel", "parallel", "arbitrary"),
            vmem_limit_bytes=_VMEM_LIMIT,
        ),
    )(xp, wtp, bp)


def mlp_forward(x, params):
    """MockModel forward: linear1 -> ReLU -> linear2.  x: [..., in_features]."""
    K, N = params["K"], params["N"]
    w1t, w2t = params["w1t"], params["w2t"]
    Kp = w1t.shape[0]
    lead = x.shape[:-1]
    x2d = x.reshape(-1, K)
    M = x2d.shape[0]
    Mp = _round_up(M, _SUBLANE)
    xp = x2d
    if Mp != M or Kp != K:
        xp = jnp.pad(x2d, ((0, Mp - M), (0, Kp - K)))

    weight_bytes = (w1t.size * w1t.dtype.itemsize
                    + w2t.size * w2t.dtype.itemsize)
    if weight_bytes <= _FUSED_WEIGHT_BUDGET:
        out_p = _fused_forward(xp, params, x.dtype)
    else:
        # Padded hidden columns are exactly zero (zero weight cols + zero bias
        # + ReLU(0)=0), so the padded hidden feeds layer 2 directly -- no
        # slice / re-pad between layers.
        h_p = _linear_padded(xp, w1t, params["b1"], apply_relu=True,
                             compute_dtype=params["compute_dtype"])
        out_p = _linear_padded(h_p, w2t, params["b2"], apply_relu=False,
                               compute_dtype=params["compute_dtype"]
                               ).astype(x.dtype)
    return out_p[:M, :N].reshape(*lead, N)


if __name__ == "__main__":
    key = jax.random.PRNGKey(0)
    k_x, k_w1, k_w2 = jax.random.split(key, 3)

    batch, seq = 2, 8
    in_features, hidden_features, out_features = 10, 20, 5

    # Deterministic params matching MockModel.__init__ (randn weights, zero bias).
    w1 = jax.random.normal(k_w1, (hidden_features, in_features), dtype=jnp.float32)
    b1 = jnp.zeros((hidden_features,), dtype=jnp.float32)
    w2 = jax.random.normal(k_w2, (out_features, hidden_features), dtype=jnp.float32)
    b2 = jnp.zeros((out_features,), dtype=jnp.float32)

    x = jax.random.normal(k_x, (batch, seq, in_features), dtype=jnp.float32)

    # One-time weight prep (transpose + pad); closed over as jit constants.
    params = prepare_params(w1, b1, w2, b2, compute_dtype=jnp.float32)
    forward = jax.jit(lambda inp: mlp_forward(inp, params))

    y = forward(x)
    jax.block_until_ready(y)

    # Plain-JAX reference of the same forward pass (full-precision matmuls).
    hp = jax.lax.Precision.HIGHEST
    h_ref = jnp.maximum(
        jnp.dot(x.reshape(-1, in_features), w1.T, precision=hp) + b1, 0.0)
    y_ref = (jnp.dot(h_ref, w2.T, precision=hp) + b2).reshape(
        batch, seq, out_features)

    assert y.shape == (batch, seq, out_features), y.shape
    assert jnp.allclose(y, y_ref, atol=1e-3, rtol=1e-3), \
        float(jnp.max(jnp.abs(y - y_ref)))

    print("KERNEL_OK")
</pallas_src>

<mosaic_0001>
module attributes {stable_mosaic.version = 11 : i64} {
  func.func @fused_mlp_kernel(%arg0: i32, %arg1: memref<8x128xf32, #tpu.memory_space<vmem>>, %arg2: memref<128x128xf32, #tpu.memory_space<vmem>>, %arg3: memref<1x128xf32, #tpu.memory_space<vmem>>, %arg4: memref<128x128xf32, #tpu.memory_space<vmem>>, %arg5: memref<1x128xf32, #tpu.memory_space<vmem>>, %arg6: memref<8x128xf32, #tpu.memory_space<vmem>>) attributes {dimension_semantics = [#tpu.dimension_semantics<parallel>], iteration_bounds = array<i64: 2>, scalar_prefetch = 0 : i64, scratch_operands = 0 : i64, tpu.core_type = #tpu.core_type<tc>, window_params = [{transform_indices = @transform_0, window_bounds = array<i64: 8, 128>}, {pipeline_mode = #tpu.pipeline_mode<synchronous>, transform_indices = @transform_1, window_bounds = array<i64: 128, 128>}, {pipeline_mode = #tpu.pipeline_mode<synchronous>, transform_indices = @transform_2, window_bounds = array<i64: 1, 128>}, {pipeline_mode = #tpu.pipeline_mode<synchronous>, transform_indices = @transform_3, window_bounds = array<i64: 128, 128>}, {pipeline_mode = #tpu.pipeline_mode<synchronous>, transform_indices = @transform_4, window_bounds = array<i64: 1, 128>}, {transform_indices = @transform_5, window_bounds = array<i64: 8, 128>}]} {
    %c0 = arith.constant 0 : index
    %c0_0 = arith.constant 0 : index
    %0 = vector.load %arg1[%c0, %c0_0] : memref<8x128xf32, #tpu.memory_space<vmem>>, vector<8x128xf32>
    %c0_1 = arith.constant 0 : index
    %c0_2 = arith.constant 0 : index
    %1 = vector.load %arg2[%c0_1, %c0_2] : memref<128x128xf32, #tpu.memory_space<vmem>>, vector<128x128xf32>
    %cst = arith.constant dense<0.000000e+00> : vector<8x128xf32>
    %2 = tpu.matmul %0, %1, %cst {dimension_numbers = #tpu.dot_dimension_numbers<[1], [0], [0], [1], [0, 0, 1, 1], [], []>, precision = #tpu.contract_precision<fp32>} : vector<8x128xf32>, vector<128x128xf32>, vector<8x128xf32> -> vector<8x128xf32>
    %c0_3 = arith.constant 0 : index
    %c0_4 = arith.constant 0 : index
    %3 = vector.load %arg3[%c0_3, %c0_4] : memref<1x128xf32, #tpu.memory_space<vmem>>, vector<1x128xf32>
    %4 = vector.broadcast %3 : vector<1x128xf32> to vector<8x128xf32>
    %5 = arith.addf %2, %4 : vector<8x128xf32>
    %cst_5 = arith.constant 0.000000e+00 : f32
    %6 = vector.broadcast %cst_5 : f32 to vector<8x128xf32>
    %7 = arith.maximumf %5, %6 : vector<8x128xf32>
    %c0_6 = arith.constant 0 : index
    %c0_7 = arith.constant 0 : index
    %8 = vector.load %arg4[%c0_6, %c0_7] : memref<128x128xf32, #tpu.memory_space<vmem>>, vector<128x128xf32>
    %cst_8 = arith.constant dense<0.000000e+00> : vector<8x128xf32>
    %9 = tpu.matmul %7, %8, %cst_8 {dimension_numbers = #tpu.dot_dimension_numbers<[1], [0], [0], [1], [0, 0, 1, 1], [], []>, precision = #tpu.contract_precision<fp32>} : vector<8x128xf32>, vector<128x128xf32>, vector<8x128xf32> -> vector<8x128xf32>
    %c0_9 = arith.constant 0 : index
    %c0_10 = arith.constant 0 : index
    %10 = vector.load %arg5[%c0_9, %c0_10] : memref<1x128xf32, #tpu.memory_space<vmem>>, vector<1x128xf32>
    %11 = vector.broadcast %10 : vector<1x128xf32> to vector<8x128xf32>
    %12 = arith.addf %9, %11 : vector<8x128xf32>
    %c0_11 = arith.constant 0 : index
    %c0_12 = arith.constant 0 : index
    %13 = vector.load %arg6[%c0_11, %c0_12] : memref<8x128xf32, #tpu.memory_space<vmem>>, vector<8x128xf32>
    tpu.vector_store %arg6[%c0_11, %c0_12], %12 {strides = array<i32>} : memref<8x128xf32, #tpu.memory_space<vmem>>, vector<8x128xf32>,
    return
  }
  func.func @transform_0(%arg0: i32) -> (i32, i32) {
    %c0_i32 = arith.constant 0 : i32
    %c0_i32_0 = arith.constant 0 : i32
    return %arg0, %c0_i32 : i32, i32
  }
  func.func @transform_1(%arg0: i32) -> (i32, i32) {
    %c0_i32 = arith.constant 0 : i32
    %c0_i32_0 = arith.constant 0 : i32
    %c0_i32_1 = arith.constant 0 : i32
    return %c0_i32, %c0_i32_0 : i32, i32
  }
  func.func @transform_2(%arg0: i32) -> (i32, i32) {
    %c0_i32 = arith.constant 0 : i32
    %c0_i32_0 = arith.constant 0 : i32
    %c0_i32_1 = arith.constant 0 : i32
    return %c0_i32, %c0_i32_0 : i32, i32
  }
  func.func @transform_3(%arg0: i32) -> (i32, i32) {
    %c0_i32 = arith.constant 0 : i32
    %c0_i32_0 = arith.constant 0 : i32
    %c0_i32_1 = arith.constant 0 : i32
    return %c0_i32, %c0_i32_0 : i32, i32
  }
  func.func @transform_4(%arg0: i32) -> (i32, i32) {
    %c0_i32 = arith.constant 0 : i32
    %c0_i32_0 = arith.constant 0 : i32
    %c0_i32_1 = arith.constant 0 : i32
    return %c0_i32, %c0_i32_0 : i32, i32
  }
  func.func @transform_5(%arg0: i32) -> (i32, i32) {
    %c0_i32 = arith.constant 0 : i32
    %c0_i32_0 = arith.constant 0 : i32
    return %arg0, %c0_i32 : i32, i32
  }
}

</mosaic_0001>

<bundles_post_ra>
// kernel: _lambda_.1
= control target key start
LH: loop header
LB: loop body
LE: loop exit
PB: predicated region body
PF: predicated region fallthrough
CT: control target
= control target key end

     0   :  { %10 = vsyncpa [#allocation3], 0  ;;  %s1757_s0 = inlined_call_operand.vmem [shape: f32[16,128], index: 0, kind: input, shape index: {}]   ;;  %s1758_s1 = inlined_call_operand.hbm [shape: f32[128,128], index: 1, kind: input, shape index: {}]   ;;  %s1759_s2 = inlined_call_operand.vmem [shape: f32[1,128], index: 2, kind: input, shape index: {}, may-alias: {2,4}]   ;;  %s1760_s3 = inlined_call_operand.hbm [shape: f32[128,128], index: 3, kind: input, shape index: {}]   ;;  %s1761_s4 = inlined_call_operand.vmem [shape: f32[1,128], index: 4, kind: input, shape index: {}, may-alias: {2,4}]   ;;  %s1762_s5 = inlined_call_operand.vmem [shape: f32[16,128], index: 5, kind: output, shape index: {}]  }
   0x1   :  { %11 = vsyncpa [#allocation5], 0  ;;  %s1210_s18 = smov 0  }
   0x2 LB: > { %s169_s21 = sshll.u32 %s1758_s1, 4  ;;  %s1219_s22 = sadd.s32 4294967295, %s1174_s18   ;;  %s1174_s18 = sphi %s1210_s18, %s17_s18   ;;  %s170_s21 = int_to_ptr.hbm [resolvable:$true] %s169_s21 }
   0x3   : > { %p1056_p0 = scmp.ge.s32.totalorder %s1174_s18, 1  ;;  %p158_p1 = scmp.lt.s32.totalorder %s1174_s18, 3 }
   0x4   : > { %p1082_p2 = scmp.eq.s32.totalorder %s1219_s22, 0  ;;  %s1176_s24 = smov [#allocation2]  }
   0x5   : > { %p1224_p3 = pnand %p1056_p0, %p158_p1  ;;  %s171_s25 = sshll.u32 %s1176_s24, 4  ;;  %s172_s25 = int_to_ptr.vmem [resolvable:$true] %s171_s25 }
   0x6   : > { %s186_s28 = sshll.u32 %s1760_s3, 4  ;;  %s1177_s29 = smov [#allocation4]   ;;  %s187_s28 = int_to_ptr.hbm [resolvable:$true] %s186_s28 }
   0x7   : > { %p1075_p4 = pneg %p1224_p3  ;;  %s188_s30 = sshll.u32 %s1177_s29, 4  ;;  %s189_s30 = int_to_ptr.vmem [resolvable:$true] %s188_s30 }
   0x8   : > { %s1178_s6 = smov 128   ;;  %s1179_s7 = smov 8  }
   0x9   : > { %p1076_p5 = pnand %p1082_p2, %p1075_p4  ;;  %214 = sbr.rel (%p1224_p3) target bundleno = 376 (0x178), region = 40 }
   0xb   : > { %1078 = dma.hbm_to_vmem [thread:$0]  (!%p1076_p5), %s170_s21, 2048, %s172_s25, [#allocation3], %s1178_s6, %s1178_s6, %s1179_s7  }
   0xc   : > { %1081 = dma.hbm_to_vmem [thread:$0]  (!%p1076_p5), %s187_s28, 2048, %s189_s30, [#allocation5], %s1178_s6, %s1178_s6, %s1179_s7  }
   0xe   : > { %1165 = dma.done.wait (%p1082_p2), [#allocation3], 2048  }
   0xf   : > { %1167 = vsyncadd (%p1082_p2), [#allocation3], 4294965248 }
  0x10   : > { %1169 = dma.done.wait (%p1082_p2), [#allocation5], 2048  }
  0x11   : > { %1171 = vsyncadd (%p1082_p2), [#allocation5], 4294965248  ;;  %v270_v0 = vld [vmem:[#allocation2 + $0x78] sm:$0xff]  ;;  %v269_v1 = vld [vmem:[#allocation2 + $0x70] sm:$0xff]  ;;  %p246_p6 = scmp.lt.s32.totalorder %s1219_s22, 1 }
  0x12   : > { %v268_v2 = vld [vmem:[#allocation2 + $0x68] sm:$0xff]  ;;  %v1245_v3 = vand.u32 4294901760, %v270_v0  ;;  %v1247_v4 = vand.u32 4294901760, %v269_v1  ;;  %v267_v6 = vld [vmem:[#allocation2 + $0x60] sm:$0xff]  ;;  %v266_v7 = vld [vmem:[#allocation2 + $0x58] sm:$0xff] }
  0x13   : > { %v1249_v5 = vand.u32 4294901760, %v268_v2  ;;  %v265_v8 = vld [vmem:[#allocation2 + $0x50] sm:$0xff]  ;;  %v1251_v9 = vand.u32 4294901760, %v267_v6  ;;  %v1253_v10 = vand.u32 4294901760, %v266_v7  ;;  %v264_v12 = vld [vmem:[#allocation2 + $0x48] sm:$0xff]  ;;  %v263_v13 = vld [vmem:[#allocation2 + $0x40] sm:$0xff] }
  0x14   : > { %v1255_v11 = vand.u32 4294901760, %v265_v8  ;;  %276 = vmatpush.msra.mxu0 %v1245_v3  ;;  %v1259_v14 = vsub.f32 %v270_v0, %v1245_v3  ;;  %v1262_v15 = vsub.f32 %v269_v1, %v1247_v4  ;;  %v1267_v17 = vand.u32 4294901760, %v264_v12  ;;  %472 = vmatpush.msra.mxu3 %v1245_v3  ;;  %v262_v21 = vld [vmem:[#allocation2 + $0x38] sm:$0xff]  ;;  %v261_v34 = vld [vmem:[#allocation2 + $0x30] sm:$0xff]  ;;  %v260_v35 = vld [vmem:[#allocation2 + $0x28] sm:$0xff]  ;;  %s1765_s22 = smov (!%p246_p6, %s1219_s22), 1 }
  0x15   : > { %v1265_v16 = vsub.f32 %v268_v2, %v1249_v5  ;;  %v1271_v18 = vsub.f32 %v267_v6, %v1251_v9  ;;  %v1274_v19 = vsub.f32 %v266_v7, %v1253_v10  ;;  %v1276_v20 = vand.u32 4294901760, %v263_v13  ;;  %v259_v42 = vld [vmem:[#allocation2 + $0x20] sm:$0xff]  ;;  %v258_v47 = vld [vmem:[#allocation2 + $0x18] sm:$0xff]  ;;  %v257_v53 = vld [vmem:[#allocation2 + $0x10] sm:$0xff]  ;;  %s1063_s8 = sshll.u32 %s1765_s22, 3 }
  0x16   : > { %278 = vmatpush.msra.mxu0 %v1247_v4  ;;  %v318_v22 = vand.u32 4294901760, %v1259_v14  ;;  %v324_v23 = vand.u32 4294901760, %v1262_v15  ;;  %v1283_v25 = vsub.f32 %v265_v8, %v1255_v11  ;;  %419 = vmatpush.msra.mxu2 %v1259_v14  ;;  %v1289_v28 = vsub.f32 %v264_v12, %v1267_v17  ;;  %v256_v61 = vld [vmem:[#allocation2 + $0x8] sm:$0xff]  ;;  %s249_s11 = scalar_lea.vmem %s1757_s0, %s1063_s8  ;;  %v255_v2 = vld [vmem:[#allocation2] sm:$0xff]  ;;  %s253_s19 = scalar_lea.vmem %s1762_s5, %s1063_s8 }
  0x17   : > { %v330_v24 = vand.u32 4294901760, %v1265_v16  ;;  %v336_v26 = vand.u32 4294901760, %v1271_v18  ;;  %v342_v27 = vand.u32 4294901760, %v1274_v19  ;;  %474 = vmatpush.msra.mxu3 %v1247_v4  ;;  %v1303_v32 = vand.u32 4294901760, %v262_v21 }
  0x18   : > { %v319_v29 = vsub.f32 %v1259_v14, %v318_v22  ;;  %280 = vmatpush.msra.mxu0 %v1249_v5  ;;  %v325_v30 = vsub.f32 %v1262_v15, %v324_v23  ;;  %422 = vmatpush.msra.mxu2 %v1262_v15  ;;  %v1307_v33 = vsub.f32 %v263_v13, %v1276_v20  ;;  %v348_v39 = vand.u32 4294901760, %v1283_v25  ;;  %v632_v14 = vld [vmem:[#allocation4 + $0x78] sm:$0xff] }
  0x19   : > { %v331_v31 = vsub.f32 %v1265_v16, %v330_v24  ;;  %476 = vmatpush.msra.mxu3 %v1249_v5  ;;  %v337_v38 = vsub.f32 %v1271_v18, %v336_v26  ;;  %v343_v40 = vsub.f32 %v1274_v19, %v342_v27  ;;  %v354_v41 = vand.u32 4294901760, %v1289_v28 }
  0x1a   : > { %v320_v36 = vand.u32 4294901760, %v319_v29  ;;  %v326_v37 = vand.u32 4294901760, %v325_v30  ;;  %282 = vmatpush.msra.mxu0 %v1251_v9  ;;  %425 = vmatpush.msra.mxu2 %v1265_v16  ;;  %v1327_v44 = vand.u32 4294901760, %v261_v34  ;;  %v1330_v45 = vsub.f32 %v262_v21, %v1303_v32  ;;  %v254_v29 = vld [vmem:[%s249_s11] sm:$0xff] }
  0x1b   : > { %478 = vmatpush.msra.mxu3 %v1251_v9  ;;  %v332_v43 = vand.u32 4294901760, %v331_v31  ;;  %v1332_v46 = vand.u32 4294901760, %v260_v35  ;;  %v360_v48 = vand.u32 4294901760, %v1307_v33  ;;  %v338_v49 = vand.u32 4294901760, %v337_v38 }
  0x1c   : > { %321 = vmatpush.msra.mxu1 %v320_v36  ;;  %284 = vmatpush.msra.mxu0 %v1253_v10  ;;  %v349_v50 = vsub.f32 %v1283_v25, %v348_v39  ;;  %v1342_v51 = vsub.f32 %v261_v34, %v1327_v44  ;;  %v1344_v52 = vand.u32 4294901760, %v259_v42  ;;  %v1346_v54 = vand.u32 4294901760, %v258_v47 }
  0x1d   : > { %428 = vmatpush.msra.mxu2 %v1271_v18  ;;  %480 = vmatpush.msra.mxu3 %v1253_v10  ;;  %v344_v55 = vand.u32 4294901760, %v343_v40  ;;  %v355_v56 = vsub.f32 %v1289_v28, %v354_v41  ;;  %v366_v57 = vand.u32 4294901760, %v1330_v45  ;;  %v1357_v58 = vsub.f32 %v260_v35, %v1332_v46 }
  0x1e   : > { %327 = vmatpush.msra.mxu1 %v326_v37  ;;  %286 = vmatpush.msra.mxu0 %v1255_v11  ;;  %v361_v59 = vsub.f32 %v1307_v33, %v360_v48  ;;  %v1362_v60 = vand.u32 4294901760, %v257_v53  ;;  %v350_v62 = vand.u32 4294901760, %v349_v50  ;;  %v372_v63 = vand.u32 4294901760, %v1342_v51 }
  0x1f   : > { %431 = vmatpush.msra.mxu2 %v1274_v19  ;;  %482 = vmatpush.msra.mxu3 %v1255_v11  ;;  %v1369_v0 = vsub.f32 %v259_v42, %v1344_v52  ;;  %v1377_v1 = vsub.f32 %v258_v47, %v1346_v54  ;;  %v356_v6 = vand.u32 4294901760, %v355_v56  ;;  %v367_v7 = vsub.f32 %v1330_v45, %v366_v57  ;;  %v625_v19 = vld [vmem:[#allocation4 + $0x40] sm:$0xff] }
  0x20   : > { %333 = vmatpush.msra.mxu1 %v332_v43  ;;  %288 = vmatpush.msra.mxu0 %v1267_v17  ;;  %v378_v8 = vand.u32 4294901760, %v1357_v58  ;;  %v1386_v12 = vand.u32 4294901760, %v256_v61  ;;  %v362_v13 = vand.u32 4294901760, %v361_v59  ;;  %v1389_v21 = vsub.f32 %v257_v53, %v1362_v60 }
  0x21   : > { %434 = vmatpush.msra.mxu2 %v1283_v25  ;;  %484 = vmatpush.msra.mxu3 %v1267_v17  ;;  %v373_v30 = vsub.f32 %v1342_v51, %v372_v63  ;;  %v384_v31 = vand.u32 4294901760, %v1369_v0  ;;  %v1398_v34 = vand.u32 4294901760, %v255_v2  ;;  %v1400_v35 = vand.u32 4294901760, %v254_v29 }
  0x22   : > { %339 = vmatpush.msra.mxu1 %v338_v49  ;;  %290 = vmatpush.msra.mxu0 %v1276_v20  ;;  %v390_v36 = vand.u32 4294901760, %v1377_v1  ;;  %v368_v37 = vand.u32 4294901760, %v367_v7  ;;  %v379_v38 = vsub.f32 %v1357_v58, %v378_v8  ;;  %v1410_v40 = vsub.f32 %v256_v61, %v1386_v12 }
  0x23   : > { %437 = vmatpush.msra.mxu2 %v1289_v28  ;;  %486 = vmatpush.msra.mxu3 %v1276_v20  ;;  %v308_v42 = vsub.f32 %v254_v29, %v1400_v35  ;;  %v374_v43 = vand.u32 4294901760, %v373_v30  ;;  %v385_v47 = vsub.f32 %v1369_v0, %v384_v31  ;;  %v396_v49 = vand.u32 4294901760, %v1389_v21 }
  0x24   : > { %345 = vmatpush.msra.mxu1 %v344_v55  ;;  %292 = vmatpush.msra.mxu0 %v1303_v32  ;;  %v1421_v50 = vsub.f32 %v255_v2, %v1398_v34  ;;  %v380_v53 = vand.u32 4294901760, %v379_v38  ;;  %v391_v55 = vsub.f32 %v1377_v1, %v390_v36  ;;  %v402_v56 = vand.u32 4294901760, %v1410_v40 }
  0x25   : > { %440 = vmatpush.msra.mxu2 %v1307_v33  ;;  %488 = vmatpush.msra.mxu3 %v1303_v32  ;;  %v309_v59 = vand.u32 4294901760, %v308_v42  ;;  %v386_v61 = vand.u32 4294901760, %v385_v47  ;;  %v630_v47 = vld [vmem:[#allocation4 + $0x68] sm:$0xff]  ;;  %v1463_v15 = vand.u32 4294901760, %v632_v14  ;;  %v624_v33 = vld [vmem:[#allocation4 + $0x38] sm:$0xff] }
  0x26   : > { %351 = vmatpush.msra.mxu1 %v350_v62  ;;  %294 = vmatpush.msra.mxu0 %v1327_v44  ;;  %v397_v62 = vsub.f32 %v1389_v21, %v396_v49  ;;  %v408_v2 = vand.u32 4294901760, %v1421_v50  ;;  %v403_v7 = vsub.f32 %v1410_v40, %v402_v56  ;;  %v1467_v16 = vand.u32 4294901760, %v630_v47 }
  0x27   : > { %443 = vmatpush.msra.mxu2 %v1330_v45  ;;  %490 = vmatpush.msra.mxu3 %v1327_v44  ;;  %v1542_v45 = vand.u32 4294901760, %v624_v33 }
  0x28   : > { %357 = vmatpush.msra.mxu1 %v356_v6  ;;  %296 = vmatpush.msra.mxu0 %v1332_v46  ;;  %v392_v6 = vand.u32 4294901760, %v391_v55  ;;  %v398_v29 = vand.u32 4294901760, %v397_v62  ;;  %v409_v30 = vsub.f32 %v1421_v50, %v408_v2 }
  0x29   : > { %446 = vmatpush.msra.mxu2 %v1342_v51  ;;  %492 = vmatpush.msra.mxu3 %v1332_v46  ;;  %v1557_v51 = vsub.f32 %v624_v33, %v1542_v45 }
  0x2a   : > { %363 = vmatpush.msra.mxu1 %v362_v13  ;;  %298 = vmatpush.msra.mxu0 %v1344_v52  ;;  %v310_v13 = vsub.f32 %v308_v42, %v309_v59 }
  0x2b   : > { %449 = vmatpush.msra.mxu2 %v1357_v58  ;;  %494 = vmatpush.msra.mxu3 %v1344_v52 }
  0x2c   : > { %369 = vmatpush.msra.mxu1 %v368_v37  ;;  %300 = vmatpush.msra.mxu0 %v1346_v54  ;;  %v404_v37 = vand.u32 4294901760, %v403_v7  ;;  %v311_v38 = vand.u32 4294901760, %v310_v13  ;;  %v1503_v13 = vand.u32 4294901760, %v625_v19 }
  0x2d   : > { %452 = vmatpush.msra.mxu2 %v1369_v0  ;;  %496 = vmatpush.msra.mxu3 %v1346_v54  ;;  %v618_v0 = vld [vmem:[#allocation4 + $0x8] sm:$0xff] }
  0x2e   : > { %375 = vmatpush.msra.mxu1 %v374_v43  ;;  %302 = vmatpush.msra.mxu0 %v1362_v60  ;;  %v410_v43 = vand.u32 4294901760, %v409_v30 }
  0x2f   : > { %455 = vmatpush.msra.mxu2 %v1377_v1  ;;  %498 = vmatpush.msra.mxu3 %v1362_v60  ;;  %v617_v1 = vld [vmem:[#allocation4] sm:$0xff] }
  0x30   : > { %381 = vmatpush.msra.mxu1 %v380_v53  ;;  %304 = vmatpush.msra.mxu0 %v1386_v12  ;;  %v627_v53 = vld [vmem:[#allocation4 + $0x50] sm:$0xff] }
  0x31   : > { %458 = vmatpush.msra.mxu2 %v1389_v21  ;;  %500 = vmatpush.msra.mxu3 %v1386_v12  ;;  %v1474_v55 = vand.u32 4294901760, %v627_v53 }
  0x32   : > { %387 = vmatpush.msra.mxu1 %v386_v61  ;;  %306 = vmatpush.msra.mxu0 %v1398_v34  ;;  %v1486_v61 = vsub.f32 %v630_v47, %v1467_v16 }
  0x33   : > { %461 = vmatpush.msra.mxu2 %v1410_v40  ;;  %502 = vmatpush.msra.mxu3 %v1398_v34  ;;  %v1508_v30 = vsub.f32 %v627_v53, %v1474_v55 }
  0x34   : > { %513 = vmatpush.msrb.mxu0 %v318_v22  ;;  %393 = vmatpush.msra.mxu1 %v392_v6  ;;  %v631_v22 = vld [vmem:[#allocation4 + $0x70] sm:$0xff]  ;;  %v692_v7 = vand.u32 4294901760, %v1486_v61 }
  0x35   : > { %464 = vmatpush.msra.mxu2 %v1421_v50  ;;  %506 = vmatmul.f32.vlgmr.msra.gmra.mxu3 %v309_v59 }
  0x36   : > { %517 = vmatpush.msrb.mxu0 %v324_v23  ;;  %399 = vmatpush.msra.mxu1 %v398_v29  ;;  %v1465_v23 = vand.u32 4294901760, %v631_v22 }
  0x37   : > { %467 = vmatmul.f32.vlgmr.msra.gmra.mxu2 %v308_v42  ;;  %312 = vmatmul.f32.vlgmr.msra.gmra.mxu0 %v311_v38  ;;  %v628_v42 = vld [vmem:[#allocation4 + $0x58] sm:$0xff] }
  0x38   : > { %521 = vmatpush.msrb.mxu0 %v330_v24  ;;  %405 = vmatpush.msra.mxu1 %v404_v37  ;;  %v629_v24 = vld [vmem:[#allocation4 + $0x60] sm:$0xff]  ;;  %v1483_v59 = vsub.f32 %v631_v22, %v1465_v23  ;;  %v693_v37 = vsub.f32 %v1486_v61, %v692_v7 }
  0x39   : > { %v1470_v18 = vand.u32 4294901760, %v629_v24  ;;  %638 = vmatpush.msrb.mxu2 %v1463_v15 }
  0x3a   : > { %525 = vmatpush.msrb.mxu0 %v336_v26  ;;  %411 = vmatpush.msra.mxu1 %v410_v43  ;;  %v1472_v26 = vand.u32 4294901760, %v628_v42  ;;  %v1531_v43 = vsub.f32 %v625_v19, %v1503_v13  ;;  %v694_v53 = vand.u32 4294901760, %v693_v37 }
  0x3b   : > { %413 = vmatmul.f32.vlgmr.msra.gmra.mxu1 %v1400_v35  ;;  %v1491_v6 = vsub.f32 %v629_v24, %v1470_v18  ;;  %640 = vmatpush.msrb.mxu2 %v1465_v23  ;;  %v710_v24 = vand.u32 4294901760, %v1508_v30 }
  0x3c   : > { %580 = vmatpush.msrb.mxu1 %v1245_v3  ;;  %529 = vmatpush.msrb.mxu0 %v342_v27  ;;  %v626_v3 = vld [vmem:[#allocation4 + $0x48] sm:$0xff]  ;;  %v1480_v27 = vsub.f32 %v632_v14, %v1463_v15 }
  0x3d   : > { %v1488_v62 = vand.u32 4294901760, %v626_v3  ;;  %v698_v29 = vand.u32 4294901760, %v1491_v6  ;;  %642 = vmatpush.msrb.mxu2 %v1467_v16  ;;  %v622_v14 = vld [vmem:[#allocation4 + $0x28] sm:$0xff] }
  0x3e   : > { %582 = vmatpush.msrb.mxu1 %v1247_v4  ;;  %533 = vmatpush.msrb.mxu0 %v348_v39  ;;  %v1495_v4 = vsub.f32 %v628_v42, %v1472_v26  ;;  %v680_v25 = vand.u32 4294901760, %v1480_v27  ;;  %v686_v39 = vand.u32 4294901760, %v1483_v59  ;;  %v621_v42 = vld [vmem:[#allocation4 + $0x20] sm:$0xff]  ;;  %v1550_v19 = vand.u32 4294901760, %v622_v14 }
  0x3f   : > { %v699_v47 = vsub.f32 %v1491_v6, %v698_v29  ;;  %644 = vmatpush.msrb.mxu2 %v1470_v18 }
  0x40   : > { %584 = vmatpush.msrb.mxu1 %v1249_v5  ;;  %537 = vmatpush.msrb.mxu0 %v354_v41  ;;  %v681_v5 = vsub.f32 %v1480_v27, %v680_v25  ;;  %v687_v28 = vsub.f32 %v1483_v59, %v686_v39  ;;  %v1520_v41 = vsub.f32 %v626_v3, %v1488_v62 }
  0x41   : > { %646 = vmatpush.msrb.mxu2 %v1472_v26 }
  0x42   : > { %586 = vmatpush.msrb.mxu1 %v1251_v9  ;;  %541 = vmatpush.msrb.mxu0 %v360_v48  ;;  %v704_v9 = vand.u32 4294901760, %v1495_v4  ;;  %v623_v48 = vld [vmem:[#allocation4 + $0x30] sm:$0xff]  ;;  %v682_v38 = vand.u32 4294901760, %v681_v5  ;;  %v688_v22 = vand.u32 4294901760, %v687_v28  ;;  %v700_v5 = vand.u32 4294901760, %v699_v47 }
  0x43   : > { %v711_v28 = vsub.f32 %v1508_v30, %v710_v24  ;;  %648 = vmatpush.msrb.mxu2 %v1474_v55 }
  0x44   : > { %588 = vmatpush.msrb.mxu1 %v1253_v10  ;;  %545 = vmatpush.msrb.mxu0 %v366_v57  ;;  %v716_v10 = vand.u32 4294901760, %v1520_v41  ;;  %v1544_v57 = vand.u32 4294901760, %v623_v48  ;;  %v705_v3 = vsub.f32 %v1495_v4, %v704_v9 }
  0x45   : > { %683 = vmatpush.msrb.mxu3 %v682_v38  ;;  %v728_v38 = vand.u32 4294901760, %v1557_v51  ;;  %650 = vmatpush.msrb.mxu2 %v1488_v62 }
  0x46   : > { %590 = vmatpush.msrb.mxu1 %v1255_v11  ;;  %549 = vmatpush.msrb.mxu0 %v372_v63  ;;  %v722_v11 = vand.u32 4294901760, %v1531_v43  ;;  %v620_v63 = vld [vmem:[#allocation4 + $0x18] sm:$0xff]  ;;  %v1564_v37 = vsub.f32 %v623_v48, %v1544_v57  ;;  %v717_v58 = vsub.f32 %v1520_v41, %v716_v10  ;;  %v706_v33 = vand.u32 4294901760, %v705_v3 }
  0x47   : > { %689 = vmatpush.msrb.mxu3 %v688_v22  ;;  %v1577_v48 = vsub.f32 %v622_v14, %v1550_v19  ;;  %v1579_v22 = vand.u32 4294901760, %v620_v63  ;;  %652 = vmatpush.msrb.mxu2 %v1503_v13 }
  0x48   : > { %592 = vmatpush.msrb.mxu1 %v1267_v17  ;;  %553 = vmatpush.msrb.mxu0 %v378_v8  ;;  %v1566_v17 = vand.u32 4294901760, %v621_v42  ;;  %v619_v8 = vld [vmem:[#allocation4 + $0x10] sm:$0xff]  ;;  %v734_v47 = vand.u32 4294901760, %v1564_v37 }
  0x49   : > { %695 = vmatpush.msrb.mxu3 %v694_v53  ;;  %v1592_v53 = vand.u32 4294901760, %v619_v8  ;;  %v740_v3 = vand.u32 4294901760, %v1577_v48  ;;  %654 = vmatpush.msrb.mxu2 %v1542_v45 }
  0x4a   : > { %594 = vmatpush.msrb.mxu1 %v1276_v20  ;;  %557 = vmatpush.msrb.mxu0 %v384_v31  ;;  %v723_v20 = vsub.f32 %v1531_v43, %v722_v11  ;;  %v712_v31 = vand.u32 4294901760, %v711_v28  ;;  %v1590_v14 = vsub.f32 %v621_v42, %v1566_v17  ;;  %v1603_v42 = vsub.f32 %v620_v63, %v1579_v22 }
  0x4b   : > { %701 = vmatpush.msrb.mxu3 %v700_v5  ;;  %v1605_v5 = vand.u32 4294901760, %v618_v0  ;;  %v735_v21 = vsub.f32 %v1564_v37, %v734_v47  ;;  %656 = vmatpush.msrb.mxu2 %v1544_v57  ;;  %v1616_v63 = vsub.f32 %v619_v8, %v1592_v53  ;;  %v1618_v28 = vand.u32 4294901760, %v617_v1 }
  0x4c   : > { %596 = vmatpush.msrb.mxu1 %v1303_v32  ;;  %561 = vmatpush.msrb.mxu0 %v390_v36  ;;  %v718_v32 = vand.u32 4294901760, %v717_v58  ;;  %v729_v36 = vsub.f32 %v1557_v51, %v728_v38  ;;  %v741_v40 = vsub.f32 %v1577_v48, %v740_v3 }
  0x4d   : > { %707 = vmatpush.msrb.mxu3 %v706_v33  ;;  %v1629_v58 = vsub.f32 %v618_v0, %v1605_v5  ;;  %658 = vmatpush.msrb.mxu2 %v1550_v19  ;;  %v1639_v8 = vsub.f32 %v617_v1, %v1618_v28 }
  0x4e   : > { %598 = vmatpush.msrb.mxu1 %v1327_v44  ;;  %565 = vmatpush.msrb.mxu0 %v396_v49  ;;  %v724_v44 = vand.u32 4294901760, %v723_v20  ;;  %v746_v49 = vand.u32 4294901760, %v1590_v14 }
  0x4f   : > { %713 = vmatpush.msrb.mxu3 %v712_v31  ;;  %v764_v20 = vand.u32 4294901760, %v1629_v58  ;;  %660 = vmatpush.msrb.mxu2 %v1566_v17  ;;  %v770_v31 = vand.u32 4294901760, %v1639_v8 }
  0x50   : > { %600 = vmatpush.msrb.mxu1 %v1332_v46  ;;  %569 = vmatpush.msrb.mxu0 %v402_v56  ;;  %v730_v46 = vand.u32 4294901760, %v729_v36  ;;  %v752_v56 = vand.u32 4294901760, %v1603_v42  ;;  %v747_v50 = vsub.f32 %v1590_v14, %v746_v49 }
  0x51   : > { %719 = vmatpush.msrb.mxu3 %v718_v32  ;;  %662 = vmatpush.msrb.mxu2 %v1579_v22  ;;  %v765_v32 = vsub.f32 %v1629_v58, %v764_v20 }
  0x52   : > { %602 = vmatpush.msrb.mxu1 %v1344_v52  ;;  %573 = vmatpush.msrb.mxu0 %v408_v2  ;;  %v736_v52 = vand.u32 4294901760, %v735_v21  ;;  %v758_v2 = vand.u32 4294901760, %v1616_v63  ;;  %v753_v33 = vsub.f32 %v1603_v42, %v752_v56  ;;  %v748_v0 = vand.u32 4294901760, %v747_v50 }
  0x53   : > { %575 = vmatmul.f32.vlgmr.msrb.gmra.mxu0 %v1400_v35  ;;  %725 = vmatpush.msrb.mxu3 %v724_v44 }
  0x54   : > { %604 = vmatpush.msrb.mxu1 %v1346_v54  ;;  %781 = vmatpush.msra.mxu0 %v1480_v27  ;;  %v742_v54 = vand.u32 4294901760, %v741_v40 }
  0x55   : > { %731 = vmatpush.msrb.mxu3 %v730_v46  ;;  %664 = vmatpush.msrb.mxu2 %v1592_v53 }
  0x56   : > { %606 = vmatpush.msrb.mxu1 %v1362_v60  ;;  %784 = vmatpush.msra.mxu0 %v1483_v59  ;;  %v759_v60 = vsub.f32 %v1616_v63, %v758_v2 }
  0x57   : > { %737 = vmatpush.msrb.mxu3 %v736_v52  ;;  %666 = vmatpush.msrb.mxu2 %v1605_v5 }
  0x58   : > { %608 = vmatpush.msrb.mxu1 %v1386_v12  ;;  %787 = vmatpush.msra.mxu0 %v1486_v61  ;;  %v754_v12 = vand.u32 4294901760, %v753_v33  ;;  %v760_v1 = vand.u32 4294901760, %v759_v60 }
  0x59   : > { %743 = vmatpush.msrb.mxu3 %v742_v54  ;;  %668 = vmatpush.msrb.mxu2 %v1618_v28 }
  0x5a   : > { %610 = vmatpush.msrb.mxu1 %v1398_v34  ;;  %790 = vmatpush.msra.mxu0 %v1491_v6  ;;  %v771_v34 = vsub.f32 %v1639_v8, %v770_v31 }
  0x5b   : > { %612 = vmatmul.f32.vlgmr.msrb.gmra.mxu1 %v1400_v35  ;;  %749 = vmatpush.msrb.mxu3 %v748_v0  ;;  %v766_v35 = vand.u32 4294901760, %v765_v32 }
  0x5c   : > { %834 = vmatpush.msra.mxu1 %v1463_v15  ;;  %793 = vmatpush.msra.mxu0 %v1495_v4  ;;  %v772_v36 = vand.u32 4294901760, %v771_v34 }
  0x5d   : > { %755 = vmatpush.msrb.mxu3 %v754_v12  ;;  %875 = vmatpush.msra.mxu2 %v680_v25 }
  0x5e   : > { %836 = vmatpush.msra.mxu1 %v1465_v23  ;;  %796 = vmatpush.msra.mxu0 %v1508_v30 }
  0x5f   : > { %761 = vmatpush.msrb.mxu3 %v760_v1  ;;  %879 = vmatpush.msra.mxu2 %v686_v39 }
  0x60   : > { %838 = vmatpush.msra.mxu1 %v1467_v16  ;;  %799 = vmatpush.msra.mxu0 %v1520_v41 }
  0x61   : > { %767 = vmatpush.msrb.mxu3 %v766_v35  ;;  %883 = vmatpush.msra.mxu2 %v692_v7 }
  0x62   : > { %840 = vmatpush.msra.mxu1 %v1470_v18  ;;  %802 = vmatpush.msra.mxu0 %v1531_v43 }
  0x63   : > { %773 = vmatpush.msrb.mxu3 %v772_v36  ;;  %887 = vmatpush.msra.mxu2 %v698_v29 }
  0x64   : > { %842 = vmatpush.msra.mxu1 %v1472_v26  ;;  %805 = vmatpush.msra.mxu0 %v1557_v51 }
  0x65   : > { %942 = vmatpush.msra.mxu3 %v1463_v15  ;;  %891 = vmatpush.msra.mxu2 %v704_v9  ;;  %v1098_v15 = vld [vmem:[%s1759_s2] ss:$0 sm:$0xff] }
  0x66   : > { %844 = vmatpush.msra.mxu1 %v1474_v55  ;;  %808 = vmatpush.msra.mxu0 %v1564_v37  ;;  %v1099_v9 = vld [vmem:[%s1761_s4] ss:$0 sm:$0xff] }
  0x67   : > { %944 = vmatpush.msra.mxu3 %v1465_v23  ;;  %895 = vmatpush.msra.mxu2 %v710_v24 }
  0x68   : > { %846 = vmatpush.msra.mxu1 %v1488_v62  ;;  %811 = vmatpush.msra.mxu0 %v1577_v48 }
  0x69   : > { %946 = vmatpush.msra.mxu3 %v1467_v16  ;;  %899 = vmatpush.msra.mxu2 %v716_v10 }
  0x6a   : > { %848 = vmatpush.msra.mxu1 %v1503_v13  ;;  %814 = vmatpush.msra.mxu0 %v1590_v14 }
  0x6b   : > { %948 = vmatpush.msra.mxu3 %v1470_v18  ;;  %903 = vmatpush.msra.mxu2 %v722_v11 }
  0x6c   : > { %850 = vmatpush.msra.mxu1 %v1542_v45  ;;  %817 = vmatpush.msra.mxu0 %v1603_v42 }
  0x6d   : > { %950 = vmatpush.msra.mxu3 %v1472_v26  ;;  %907 = vmatpush.msra.mxu2 %v728_v38 }
  0x6e   : > { %852 = vmatpush.msra.mxu1 %v1544_v57  ;;  %820 = vmatpush.msra.mxu0 %v1616_v63 }
  0x6f   : > { %952 = vmatpush.msra.mxu3 %v1474_v55  ;;  %911 = vmatpush.msra.mxu2 %v734_v47 }
  0x70   : > { %854 = vmatpush.msra.mxu1 %v1550_v19  ;;  %823 = vmatpush.msra.mxu0 %v1629_v58 }
  0x71   : > { %954 = vmatpush.msra.mxu3 %v1488_v62  ;;  %915 = vmatpush.msra.mxu2 %v740_v3 }
  0x72   : > { %856 = vmatpush.msra.mxu1 %v1566_v17  ;;  %826 = vmatpush.msra.mxu0 %v1639_v8 }
  0x73   : > { %956 = vmatpush.msra.mxu3 %v1503_v13  ;;  %919 = vmatpush.msra.mxu2 %v746_v49 }
  0x74   : > { %858 = vmatpush.msra.mxu1 %v1579_v22 }
  0x75   : > { %958 = vmatpush.msra.mxu3 %v1542_v45  ;;  %923 = vmatpush.msra.mxu2 %v752_v56 }
  0x76   : > { %860 = vmatpush.msra.mxu1 %v1592_v53 }
  0x77   : > { %960 = vmatpush.msra.mxu3 %v1544_v57  ;;  %927 = vmatpush.msra.mxu2 %v758_v2 }
  0x78   : > { %862 = vmatpush.msra.mxu1 %v1605_v5 }
  0x79   : > { %962 = vmatpush.msra.mxu3 %v1550_v19  ;;  %931 = vmatpush.msra.mxu2 %v764_v20 }
  0x7a   : > { %864 = vmatpush.msra.mxu1 %v1618_v28 }
  0x7b   : > { %964 = vmatpush.msra.mxu3 %v1566_v17  ;;  %935 = vmatpush.msra.mxu2 %v770_v31 }
  0x7d   : > { %966 = vmatpush.msra.mxu3 %v1579_v22 }
  0x7f   : > { %968 = vmatpush.msra.mxu3 %v1592_v53 }
  0x81   : > { %970 = vmatpush.msra.mxu3 %v1605_v5 }
  0x83   : > { %972 = vmatpush.msra.mxu3 %v1618_v28 }
  0xb4   : > { %v313_v23 = vpop.f32.mrf.mxu0 }
  0xb5   : > { %v314_v16 = vadd.f32 %v1098_v15, %v313_v23 }
  0xb8   : > { %v414_v18 = vpop.f32.mrf.mxu1  ;;  %v507_v59 = vpop.f32.mrf.mxu3 }
  0xb9   : > { %v415_v26 = vadd.f32 %v414_v18, %v314_v16 }
  0xba   : > { %v468_v55 = vpop.f32.mrf.mxu2 }
  0xbb   : > { %v469_v27 = vadd.f32 %v468_v55, %v415_v26 }
  0xbd   : > { %v508_v61 = vadd.f32 %v507_v59, %v469_v27 }
  0xd0   : > { %v576_v62 = vpop.f32.mrf.mxu0 }
  0xd1   : > { %v577_v6 = vadd.f32 %v576_v62, %v508_v61 }
  0xd8   : > { %v613_v4 = vpop.f32.mrf.mxu1 }
  0xd9   : > { %v614_v25 = vadd.f32 %v613_v4, %v577_v6 }
  0xdb   : > { %v616_v39 = vmax.f32 %v614_v25, 0.0 }
  0xdd   : > { %v669_v7 = vand.u32 4294901760, %v616_v39 }
  0xdf   : > { %v670_v13 = vsub.f32 %v616_v39, %v669_v7  ;;  %775 = vmatmul.f32.vlgmr.msrb.gmra.mxu3 %v669_v7 }
  0xe1   : > { %829 = vmatmul.f32.vlgmr.msra.gmra.mxu0 %v670_v13  ;;  %v671_v29 = vand.u32 4294901760, %v670_v13 }
  0xe3   : > { %868 = vmatmul.f32.vlgmr.msra.gmra.mxu1 %v671_v29  ;;  %v672_v30 = vsub.f32 %v670_v13, %v671_v29 }
  0xe5   : > { %v673_v41 = vand.u32 4294901760, %v672_v30 }
  0xe7   : > { %674 = vmatmul.f32.vlgmr.msrb.gmra.mxu2 %v673_v41  ;;  %974 = vmatmul.f32.vlgmr.msra.gmra.mxu3 %v669_v7 }
  0xef   : > { %937 = vmatmul.f32.vlgmr.msra.gmra.mxu2 %v669_v7 }
 0x15e   : > { %v830_v57 = vpop.f32.mrf.mxu0 }
 0x160   : > { %v869_v11 = vpop.f32.mrf.mxu1 }
 0x162   : > { %v776_v43 = vpop.f32.mrf.mxu3 }
 0x16a   : > { %v675_v24 = vpop.f32.mrf.mxu2  ;;  %v975_v38 = vpop.f32.mrf.mxu3 }
 0x16b   : > { %v676_v10 = vadd.f32 %v1099_v9, %v675_v24 }
 0x16d   : > { %v777_v45 = vadd.f32 %v776_v43, %v676_v10 }
 0x16f   : > { %v831_v19 = vadd.f32 %v830_v57, %v777_v45 }
 0x171   : > { %v870_v51 = vadd.f32 %v869_v11, %v831_v19 }
 0x172   : > { %v938_v37 = vpop.f32.mrf.mxu2 }
 0x173   : > { %v939_v17 = vadd.f32 %v938_v37, %v870_v51 }
 0x175   : > { %v976_v48 = vadd.f32 %v975_v38, %v939_v17 }
 0x177   : > { %978 = vst [vmem:[%s253_s19] sm:$0xff] %v976_v48 }
 0x178 PF: > { %s17_s18 = sadd.s32 1, %s1174_s18  }
 0x179   : > { %p14_p7 = scmp.ge.s32.totalorder %s17_s18, 4  }
 0x17b   :  { %16 = sbr.rel (!%p14_p7) target bundleno = 2 (0x2), region = 79 }
 0x180   :  { %998 = vsyncpa [#allocation3], 1 }
 0x181   :  { %1000 = vsyncpa [#allocation3 + $0x1], 1 }
 0x182   :  { %1001 = vsyncpa [#allocation5], 1 }

</bundles_post_ra>
